<compile_context>
chip_gen: v5e
topology: v5e:2x2
jax: 0.10.0
libtpu: 0.0.40
codegen_flags: <defaults>
</compile_context>

<pallas_src>
import functools

import jax
import jax.numpy as jnp
from jax.experimental import pallas as pl
from jax.experimental.pallas import tpu as pltpu


_LANE = 128
# Rows per chunk: 1024 * 128 * 4 B = 0.5 MiB per f32 input tile
# (2 inputs x 2 pipeline buffers ~ 2 MiB VMEM) — safe and near the HBM
# roofline on v5e / v6e / v7x alike.
_TR_MAX = 1024


# ----------------------------- Pallas kernel ------------------------------

def _sqdiff_chunk_kernel(s_ref, t_ref, out_ref, *, tr, rows_valid, mask_rows):
    """Per-chunk partial sum of (s - t)^2, reduced over rows -> (1, 128)."""
    d = s_ref[...].astype(jnp.float32) - t_ref[...].astype(jnp.float32)
    dd = d * d
    if mask_rows:
        # Last chunk can be partial: rows >= rows_valid hold undefined data.
        row = (jax.lax.broadcasted_iota(jnp.int32, dd.shape, 0)
               + pl.program_id(0) * tr)
        dd = jnp.where(row < rows_valid, dd, jnp.float32(0.0))
    # Row reduce only: VPU adds of the tile's vregs + one sublane reduce.
    out_ref[...] = jnp.sum(dd, axis=0, keepdims=True)


def _layer_mse(s, t):
    """mean((s - t)^2) over one layer's feature map, via a chunked Pallas reduce."""
    assert s.size == t.size, (
        "student/teacher features of a distilled layer must have matching size")
    n = int(s.size)
    s = jnp.ravel(s)          # native dtype kept; contiguous ravel is free
    t = jnp.ravel(t)

    pad = (-n) % _LANE
    if pad:
        # Rare path: zero-pad BOTH inputs, so padded tail contributes 0.
        s = jnp.pad(s, (0, pad))
        t = jnp.pad(t, (0, pad))
    r = (n + pad) // _LANE
    s2 = s.reshape(r, _LANE)  # lane-dense view; free for contiguous arrays
    t2 = t.reshape(r, _LANE)

    tr = r if r <= _TR_MAX else _TR_MAX
    num_chunks = (r + tr - 1) // tr
    mask_rows = (r % tr) != 0

    kernel = functools.partial(
        _sqdiff_chunk_kernel, tr=tr, rows_valid=r, mask_rows=mask_rows)

    partials = pl.pallas_call(
        kernel,
        out_shape=jax.ShapeDtypeStruct((num_chunks, _LANE), jnp.float32),
        grid_spec=pltpu.PrefetchScalarGridSpec(
            num_scalar_prefetch=0,
            grid=(num_chunks,),
            in_specs=[
                pl.BlockSpec((tr, _LANE), lambda k: (k, 0)),
                pl.BlockSpec((tr, _LANE), lambda k: (k, 0)),
            ],
            out_specs=pl.BlockSpec((1, _LANE), lambda k: (k, 0)),
        ),
        compiler_params=pltpu.CompilerParams(
            # Independent chunks -> parallel grid axis (uses both TCs on v7x).
            dimension_semantics=("parallel",),
        ),
    )(s2, t2)

    # Tiny final cross-lane reduce + 1/N scale in JAX (negligible traffic).
    return jnp.sum(partials) / jnp.float32(n)


# --------------------------- Module translation ---------------------------

class TwoGroupLayerWiseDistiller:
    """JAX/Pallas port of TwoGroupLayerWiseDistiller (default config).

    single_direction=True, intra=False: only student -> teacher distillation.
    """

    def __init__(self, single_direction=True, intra=False,
                 distill_layers=None, detach_t=True):
        self.single_direction = single_direction
        self.intra = intra
        self.exclude_self = True if intra else False
        self.detach_t = detach_t
        if distill_layers is None:
            self.distill_layers = None
        elif isinstance(distill_layers, int):
            self.distill_layers = [distill_layers]
        else:
            self.distill_layers = list(distill_layers)
        # TODO(synk): inter/intra multi-model group pairing (intra=True,
        # single_direction=False) has no concrete spec in the reference
        # forward (it raises NotImplementedError); only the default s->t
        # path is implemented here.

    def get_distill_layers(self, xs_s1md, xs_t1md):
        if self.distill_layers is None:
            return list(range(min(len(xs_s1md), len(xs_t1md))))
        return list(self.distill_layers)

    def __call__(self, xs_s1md, xs_t1md):
        """xs_s1md / xs_t1md: sequences of per-layer feature maps (NCHW)."""
        layers = self.get_distill_layers(xs_s1md, xs_t1md)
        total = jnp.float32(0.0)
        for l in layers:
            t = xs_t1md[l]
            if self.detach_t:
                t = jax.lax.stop_gradient(t)
            total = total + _layer_mse(xs_s1md[l], t)
        return total


# --------------------------------- main -----------------------------------

if __name__ == "__main__":
    key = jax.random.PRNGKey(0)

    # Small, per-layer-varying shapes (feature-pyramid style).  The last
    # layer exercises the multi-chunk + partial-tail-mask path
    # (2*32*48*48 = 147456 elements -> 1152 rows -> 2 chunks of 1024).
    layer_shapes = [
        (2, 4, 16, 16),
        (2, 8, 16, 16),
        (2, 4, 16, 16),
        (2, 32, 48, 48),
    ]
    num_layers = len(layer_shapes)

    keys = jax.random.split(key, 2 * num_layers)
    xs_s = [jax.random.normal(keys[i], layer_shapes[i], dtype=jnp.float32)
            for i in range(num_layers)]
    xs_t = [jax.random.normal(keys[num_layers + i], layer_shapes[i],
                              dtype=jnp.float32)
            for i in range(num_layers)]

    distiller = TwoGroupLayerWiseDistiller(single_direction=True, intra=False,
                                           distill_layers=None, detach_t=True)
    loss = distiller(xs_s, xs_t)
    loss = jax.block_until_ready(loss)

    # Pure-JAX reference check (sum over layers of per-layer MSE).
    ref = sum(jnp.mean((s.astype(jnp.float32) - t.astype(jnp.float32)) ** 2)
              for s, t in zip(xs_s, xs_t))
    assert jnp.allclose(loss, ref, rtol=1e-4, atol=1e-5), (loss, ref)

    print("KERNEL_OK")
</pallas_src>

<mosaic_0001>
module attributes {stable_mosaic.version = 11 : i64} {
  func.func @_sqdiff_chunk_kernel(%arg0: i32, %arg1: memref<16x128xf32, #tpu.memory_space<vmem>>, %arg2: memref<16x128xf32, #tpu.memory_space<vmem>>, %arg3: memref<1x128xf32, #tpu.memory_space<vmem>>) attributes {dimension_semantics = [#tpu.dimension_semantics<parallel>], iteration_bounds = array<i64: 1>, scalar_prefetch = 0 : i64, scratch_operands = 0 : i64, tpu.core_type = #tpu.core_type<tc>, window_params = [{transform_indices = @transform_0, window_bounds = array<i64: 16, 128>}, {transform_indices = @transform_1, window_bounds = array<i64: 16, 128>}, {transform_indices = @transform_2, window_bounds = array<i64: 1, 128>}]} {
    %c0 = arith.constant 0 : index
    %c0_0 = arith.constant 0 : index
    %0 = vector.load %arg1[%c0, %c0_0] : memref<16x128xf32, #tpu.memory_space<vmem>>, vector<16x128xf32>
    %c0_1 = arith.constant 0 : index
    %c0_2 = arith.constant 0 : index
    %1 = vector.load %arg2[%c0_1, %c0_2] : memref<16x128xf32, #tpu.memory_space<vmem>>, vector<16x128xf32>
    %2 = arith.subf %0, %1 : vector<16x128xf32>
    %3 = arith.mulf %2, %2 : vector<16x128xf32>
    %cst = arith.constant dense<0.000000e+00> : vector<128xf32>
    %4 = vector.multi_reduction <add>, %3, %cst [0] : vector<16x128xf32> to vector<128xf32>
    %5 = vector.shape_cast %4 : vector<128xf32> to vector<1x128xf32>
    %c0_3 = arith.constant 0 : index
    %c0_4 = arith.constant 0 : index
    %6 = vector.load %arg3[%c0_3, %c0_4] : memref<1x128xf32, #tpu.memory_space<vmem>>, vector<1x128xf32>
    tpu.vector_store %arg3[%c0_3, %c0_4], %5 {strides = array<i32>} : memref<1x128xf32, #tpu.memory_space<vmem>>, vector<1x128xf32>,
    return
  }
  func.func @transform_0(%arg0: i32) -> (i32, i32) {
    %c0_i32 = arith.constant 0 : i32
    %c0_i32_0 = arith.constant 0 : i32
    return %arg0, %c0_i32 : i32, i32
  }
  func.func @transform_1(%arg0: i32) -> (i32, i32) {
    %c0_i32 = arith.constant 0 : i32
    %c0_i32_0 = arith.constant 0 : i32
    return %arg0, %c0_i32 : i32, i32
  }
  func.func @transform_2(%arg0: i32) -> (i32, i32) {
    %c0_i32 = arith.constant 0 : i32
    %c0_i32_0 = arith.constant 0 : i32
    return %arg0, %c0_i32 : i32, i32
  }
}

</mosaic_0001>

<bundles_post_ra>
// kernel: tpu_custom_call.1
= control target key start
LH: loop header
LB: loop body
LE: loop exit
PB: predicated region body
PF: predicated region fallthrough
CT: control target
= control target key end

     0   :  { %7 = vsyncpa [#allocation3], 0  ;;  %s190_s0 = inlined_call_operand.hbm [shape: f32[16,128], index: 0, kind: input, shape index: {}]   ;;  %s191_s1 = inlined_call_operand.hbm [shape: f32[16,128], index: 1, kind: input, shape index: {}]   ;;  %s192_s2 = inlined_call_operand.hbm [shape: f32[1,128], index: 2, kind: output, shape index: {}]  }
   0x1   :  { %8 = vsyncpa [#allocation6], 0 }
   0x2   :  { %9 = vsyncpa [#allocation4], 0  ;;  %s14_s11 = sshll.u32 %s190_s0, 4  ;;  %s161_s12 = smov [#allocation2]   ;;  %s15_s11 = int_to_ptr.hbm [resolvable:$true] %s14_s11 }
   0x3   :  { %s16_s13 = sshll.u32 %s161_s12, 4  ;;  %s27_s16 = sshll.u32 %s191_s1, 4  ;;  %s17_s13 = int_to_ptr.vmem [resolvable:$true] %s16_s13  ;;  %s28_s16 = int_to_ptr.hbm [resolvable:$true] %s27_s16 }
   0x4   :  { %s162_s17 = smov 128   ;;  %s163_s18 = smov 8  }
   0x5   :  { %22 = dma.hbm_to_vmem [thread:$0]  %s15_s11, 256, %s17_s13, [#allocation3], %s162_s17, %s162_s17, %s163_s18  }
   0x6   :  { %s164_s19 = smov [#allocation5]  }
   0x7   :  { %s29_s20 = sshll.u32 %s164_s19, 4  ;;  %s30_s20 = int_to_ptr.vmem [resolvable:$true] %s29_s20 }
   0x8   :  { %35 = dma.hbm_to_vmem [thread:$0]  %s28_s16, 256, %s30_s20, [#allocation6], %s162_s17, %s162_s17, %s163_s18  }
   0x9   :  { %155 = dma.done.wait [#allocation3], 256  }
   0xa   :  { %156 = vsyncadd [#allocation3], 4294967040 }
   0xb   :  { %157 = dma.done.wait [#allocation6], 256  }
   0xc   :  { %158 = vsyncadd [#allocation6], 4294967040  ;;  %v44_v0 = vld [vmem:[#allocation2] sm:$0xff]  ;;  %v45_v1 = vld [vmem:[#allocation2 + $0x8] sm:$0xff]  ;;  %s165_s0 = smov [#allocation7]   ;;  %s67_s23 = sshll.u32 %s192_s2, 4  ;;  %s68_s23 = int_to_ptr.hbm [resolvable:$true] %s67_s23 }
   0xd   :  { %v46_v2 = vld [vmem:[#allocation5] sm:$0xff]  ;;  %v47_v3 = vld [vmem:[#allocation5 + $0x8] sm:$0xff]  ;;  %s65_s1 = sshll.u32 %s165_s0, 4  ;;  %s66_s1 = int_to_ptr.vmem [resolvable:$true] %s65_s1 }
   0xe   :  { %v48_v4 = vsub.f32 %v44_v0, %v46_v2  ;;  %v49_v5 = vsub.f32 %v45_v1, %v47_v3 }
  0x10   :  { %v50_v6 = vmul.f32 %v48_v4, %v48_v4  ;;  %v51_v7 = vmul.f32 %v49_v5, %v49_v5 }
  0x12   :  { %v52_v8 = vadd.f32 %v51_v7, %v50_v6 }
  0x14   :  { %v53_v9 = vrot.slane %v52_v8, 4 }
  0x16   :  { %v54_v10 = vadd.f32 %v53_v9, %v52_v8 }
  0x18   :  { %v55_v11 = vrot.slane %v54_v10, 2 }
  0x1a   :  { %v56_v12 = vadd.f32 %v55_v11, %v54_v10 }
  0x1c   :  { %v57_v13 = vrot.slane %v56_v12, 1 }
  0x1e   :  { %v58_v14 = vadd.f32 %v57_v13, %v56_v12 }
  0x20   :  { %59 = vst [vmem:[#allocation7] sm:$0x1] %v58_v14 }
  0x21   :  { %70 = dma.vmem_to_hbm [thread:$0]  %s66_s1, 16, %s68_s23, [#allocation4]  }
  0x22   :  { %159 = dma.done.wait [#allocation4], 16  }
  0x23   :  { %160 = vsyncadd [#allocation4], 4294967280 }
  0x24   :  { %75 = vsyncpa [#allocation3], 1 }
  0x25   :  { %76 = vsyncpa [#allocation6], 1 }
  0x26   :  { %77 = vsyncpa [#allocation4], 1 }

</bundles_post_ra>
